<compile_context>
chip_gen: v7x
topology: tpu7x:2x2x1
jax: 0.10.0
libtpu: 0.0.40
codegen_flags: <defaults>
</compile_context>

<pallas_src>
import jax
import jax.numpy as jnp
from jax.experimental import pallas as pl
from jax.experimental.pallas import tpu as pltpu

IN_F = 11
H1_F = 64
H2_F = 32
NUM_CLASSES = 6
CLS_PAD = 8           # class dim padded to 8 (sublane/minor granularity), not 128
MAX_TILE_B = 8192     # large batch tile; only 8-row (f32) sublane alignment matters
NEG_INF = -1e30       # padding logit; exp() underflows to exactly 0 in f32


def mlp_kernel(x_ref, w1_ref, b1_ref, w2_ref, b2_ref, w3_ref, b3_ref, o_ref):
    # x: (TILE_B, 11) f32 in VMEM; cast to bf16 in-registers for the MXU
    x = x_ref[...].astype(jnp.bfloat16)
    # fc1 + relu (f32 accumulate, cast back to bf16 for next MXU op)
    h1 = jnp.dot(x, w1_ref[...], preferred_element_type=jnp.float32) + b1_ref[...]
    h1 = jnp.maximum(h1, 0.0).astype(jnp.bfloat16)
    # fc2 + relu
    h2 = jnp.dot(h1, w2_ref[...], preferred_element_type=jnp.float32) + b2_ref[...]
    h2 = jnp.maximum(h2, 0.0).astype(jnp.bfloat16)
    # fc3 (padded to 8 classes: padded lanes carry -1e30 bias and zero weights,
    # so exp(shifted) is exactly 0 there and the softmax covers only 6 classes)
    logits = jnp.dot(h2, w3_ref[...], preferred_element_type=jnp.float32) + b3_ref[...]
    m = jnp.max(logits, axis=-1, keepdims=True)
    shifted = logits - m
    lse = jnp.log(jnp.sum(jnp.exp(shifted), axis=-1, keepdims=True))
    o_ref[...] = shifted - lse


def _round_up(n, m):
    return ((n + m - 1) // m) * m


def _choose_tile_b(B):
    if B <= 16:
        # tiny batch: a single clean tile, 8-row (f32 sublane) aligned
        return max(8, _round_up(B, 8))
    if B <= 2 * MAX_TILE_B:
        # split into >=2 tiles so both v7x TensorCores get work; the extra
        # ~0.35us grid step is negligible on single-TC v5e/v6e
        return _round_up(pl.cdiv(B, 2), 16)
    return MAX_TILE_B


def prepare_params(params):
    """One-time parameter prep: bf16 MXU operands, fc3 padded to 8 classes."""
    w1, b1, w2, b2, w3, b3 = params
    w1_bf = w1.astype(jnp.bfloat16)
    w2_bf = w2.astype(jnp.bfloat16)
    w3_p = jnp.pad(w3, ((0, 0), (0, CLS_PAD - NUM_CLASSES))).astype(jnp.bfloat16)
    b3_p = jnp.concatenate(
        [b3.astype(jnp.float32),
         jnp.full((1, CLS_PAD - NUM_CLASSES), NEG_INF, jnp.float32)], axis=1)
    return (w1_bf, b1.astype(jnp.float32), w2_bf, b2.astype(jnp.float32),
            w3_p, b3_p)


def net_forward(x, prepared_params):
    w1_bf, b1, w2_bf, b2, w3_p, b3_p = prepared_params
    B = x.shape[0]

    tile_b = _choose_tile_b(B)
    grid = (pl.cdiv(B, tile_b),)   # ragged last block handled by Pallas masking

    cost = pl.CostEstimate(
        flops=2 * B * (IN_F * H1_F + H1_F * H2_F + H2_F * CLS_PAD),
        transcendentals=B * (CLS_PAD + 1),
        bytes_accessed=B * (IN_F * 4 + CLS_PAD * 4)
        + (IN_F * H1_F + H1_F * H2_F + H2_F * CLS_PAD) * 2
        + (H1_F + H2_F + CLS_PAD) * 4,
    )

    out = pl.pallas_call(
        mlp_kernel,
        out_shape=jax.ShapeDtypeStruct((B, CLS_PAD), jnp.float32),
        grid_spec=pltpu.PrefetchScalarGridSpec(
            num_scalar_prefetch=0,
            grid=grid,
            in_specs=[
                pl.BlockSpec((tile_b, IN_F), lambda i: (i, 0)),   # x: streamed per tile
                pl.BlockSpec((IN_F, H1_F), lambda i: (0, 0)),     # weights/biases:
                pl.BlockSpec((1, H1_F), lambda i: (0, 0)),        # constant block idx
                pl.BlockSpec((H1_F, H2_F), lambda i: (0, 0)),     # -> VMEM-resident,
                pl.BlockSpec((1, H2_F), lambda i: (0, 0)),        #    no re-DMA
                pl.BlockSpec((H2_F, CLS_PAD), lambda i: (0, 0)),
                pl.BlockSpec((1, CLS_PAD), lambda i: (0, 0)),
            ],
            out_specs=pl.BlockSpec((tile_b, CLS_PAD), lambda i: (i, 0)),
        ),
        compiler_params=pltpu.CompilerParams(
            dimension_semantics=("parallel",),          # shard batch tiles across TCs
            vmem_limit_bytes=40 * 1024 * 1024,          # ~16 MiB used at tile_b=8192
        ),
        cost_estimate=cost,
    )(x, w1_bf, b1, w2_bf, b2, w3_p, b3_p)

    return out[:B, :NUM_CLASSES]


def init_params(key):
    # Deterministic init mimicking nn.Linear default (uniform +/- 1/sqrt(fan_in)).
    dims = [(IN_F, H1_F), (H1_F, H2_F), (H2_F, NUM_CLASSES)]
    params = []
    for i, (fan_in, fan_out) in enumerate(dims):
        kw, kb = jax.random.split(jax.random.fold_in(key, i))
        bound = 1.0 / jnp.sqrt(fan_in)
        w = jax.random.uniform(kw, (fan_in, fan_out), jnp.float32, -bound, bound)
        b = jax.random.uniform(kb, (1, fan_out), jnp.float32, -bound, bound)
        params.extend([w, b])
    return tuple(params)


def reference_forward(x, params):
    w1, b1, w2, b2, w3, b3 = params
    h1 = jnp.maximum(x @ w1 + b1, 0.0)
    h2 = jnp.maximum(h1 @ w2 + b2, 0.0)
    logits = h2 @ w3 + b3
    return jax.nn.log_softmax(logits, axis=1)


if __name__ == "__main__":
    key = jax.random.PRNGKey(0)
    params = init_params(key)
    prepared = prepare_params(params)
    x = jax.random.normal(jax.random.fold_in(key, 100), (8, IN_F), dtype=jnp.float32)

    out = net_forward(x, prepared)
    out = jax.block_until_ready(out)

    ref = reference_forward(x, params)  # f32 reference
    assert out.shape == (8, NUM_CLASSES)
    # bf16 MXU operands with f32 accumulation -> relaxed tolerance vs f32 reference
    assert jnp.allclose(out, ref, atol=5e-2, rtol=5e-2), (
        f"max abs err {jnp.max(jnp.abs(out - ref))}")
    print("KERNEL_OK")
</pallas_src>

<mosaic_0001>
module attributes {stable_mosaic.version = 11 : i64} {
  func.func @mlp_kernel(%arg0: i32, %arg1: memref<8x11xf32, #tpu.memory_space<vmem>>, %arg2: memref<11x64xbf16, #tpu.memory_space<vmem>>, %arg3: memref<1x64xf32, #tpu.memory_space<vmem>>, %arg4: memref<64x32xbf16, #tpu.memory_space<vmem>>, %arg5: memref<1x32xf32, #tpu.memory_space<vmem>>, %arg6: memref<32x8xbf16, #tpu.memory_space<vmem>>, %arg7: memref<1x8xf32, #tpu.memory_space<vmem>>, %arg8: memref<8x8xf32, #tpu.memory_space<vmem>>) attributes {dimension_semantics = [#tpu.dimension_semantics<parallel>], iteration_bounds = array<i64: 1>, scalar_prefetch = 0 : i64, scratch_operands = 0 : i64, tpu.core_type = #tpu.core_type<tc>, window_params = [{transform_indices = @transform_0, window_bounds = array<i64: 8, 11>}, {pipeline_mode = #tpu.pipeline_mode<synchronous>, transform_indices = @transform_1, window_bounds = array<i64: 11, 64>}, {pipeline_mode = #tpu.pipeline_mode<synchronous>, transform_indices = @transform_2, window_bounds = array<i64: 1, 64>}, {pipeline_mode = #tpu.pipeline_mode<synchronous>, transform_indices = @transform_3, window_bounds = array<i64: 64, 32>}, {pipeline_mode = #tpu.pipeline_mode<synchronous>, transform_indices = @transform_4, window_bounds = array<i64: 1, 32>}, {pipeline_mode = #tpu.pipeline_mode<synchronous>, transform_indices = @transform_5, window_bounds = array<i64: 32, 8>}, {pipeline_mode = #tpu.pipeline_mode<synchronous>, transform_indices = @transform_6, window_bounds = array<i64: 1, 8>}, {transform_indices = @transform_7, window_bounds = array<i64: 8, 8>}]} {
    %c0 = arith.constant 0 : index
    %c0_0 = arith.constant 0 : index
    %0 = vector.load %arg1[%c0, %c0_0] : memref<8x11xf32, #tpu.memory_space<vmem>>, vector<8x11xf32>
    %1 = arith.truncf %0 : vector<8x11xf32> to vector<8x11xbf16>
    %c0_1 = arith.constant 0 : index
    %c0_2 = arith.constant 0 : index
    %2 = vector.load %arg2[%c0_1, %c0_2] : memref<11x64xbf16, #tpu.memory_space<vmem>>, vector<11x64xbf16>
    %cst = arith.constant dense<0.000000e+00> : vector<8x64xf32>
    %3 = tpu.matmul %1, %2, %cst {dimension_numbers = #tpu.dot_dimension_numbers<[1], [0], [0], [1], [0, 0, 1, 1], [], []>} : vector<8x11xbf16>, vector<11x64xbf16>, vector<8x64xf32> -> vector<8x64xf32>
    %c0_3 = arith.constant 0 : index
    %c0_4 = arith.constant 0 : index
    %4 = vector.load %arg3[%c0_3, %c0_4] : memref<1x64xf32, #tpu.memory_space<vmem>>, vector<1x64xf32>
    %5 = vector.broadcast %4 : vector<1x64xf32> to vector<8x64xf32>
    %6 = arith.addf %3, %5 : vector<8x64xf32>
    %cst_5 = arith.constant 0.000000e+00 : f32
    %7 = vector.broadcast %cst_5 : f32 to vector<8x64xf32>
    %8 = arith.maximumf %6, %7 : vector<8x64xf32>
    %9 = arith.truncf %8 : vector<8x64xf32> to vector<8x64xbf16>
    %c0_6 = arith.constant 0 : index
    %c0_7 = arith.constant 0 : index
    %10 = vector.load %arg4[%c0_6, %c0_7] : memref<64x32xbf16, #tpu.memory_space<vmem>>, vector<64x32xbf16>
    %cst_8 = arith.constant dense<0.000000e+00> : vector<8x32xf32>
    %11 = tpu.matmul %9, %10, %cst_8 {dimension_numbers = #tpu.dot_dimension_numbers<[1], [0], [0], [1], [0, 0, 1, 1], [], []>} : vector<8x64xbf16>, vector<64x32xbf16>, vector<8x32xf32> -> vector<8x32xf32>
    %c0_9 = arith.constant 0 : index
    %c0_10 = arith.constant 0 : index
    %12 = vector.load %arg5[%c0_9, %c0_10] : memref<1x32xf32, #tpu.memory_space<vmem>>, vector<1x32xf32>
    %13 = vector.broadcast %12 : vector<1x32xf32> to vector<8x32xf32>
    %14 = arith.addf %11, %13 : vector<8x32xf32>
    %cst_11 = arith.constant 0.000000e+00 : f32
    %15 = vector.broadcast %cst_11 : f32 to vector<8x32xf32>
    %16 = arith.maximumf %14, %15 : vector<8x32xf32>
    %17 = arith.truncf %16 : vector<8x32xf32> to vector<8x32xbf16>
    %c0_12 = arith.constant 0 : index
    %c0_13 = arith.constant 0 : index
    %18 = vector.load %arg6[%c0_12, %c0_13] : memref<32x8xbf16, #tpu.memory_space<vmem>>, vector<32x8xbf16>
    %cst_14 = arith.constant dense<0.000000e+00> : vector<8x8xf32>
    %19 = tpu.matmul %17, %18, %cst_14 {dimension_numbers = #tpu.dot_dimension_numbers<[1], [0], [0], [1], [0, 0, 1, 1], [], []>} : vector<8x32xbf16>, vector<32x8xbf16>, vector<8x8xf32> -> vector<8x8xf32>
    %c0_15 = arith.constant 0 : index
    %c0_16 = arith.constant 0 : index
    %20 = vector.load %arg7[%c0_15, %c0_16] : memref<1x8xf32, #tpu.memory_space<vmem>>, vector<1x8xf32>
    %21 = vector.broadcast %20 : vector<1x8xf32> to vector<8x8xf32>
    %22 = arith.addf %19, %21 : vector<8x8xf32>
    %cst_17 = arith.constant dense<0xFF800000> : vector<8xf32>
    %23 = vector.multi_reduction <maximumf>, %22, %cst_17 [1] : vector<8x8xf32> to vector<8xf32>
    %24 = vector.shape_cast %23 : vector<8xf32> to vector<8x1xf32>
    %25 = vector.broadcast %24 : vector<8x1xf32> to vector<8x8xf32>
    %26 = arith.subf %22, %25 : vector<8x8xf32>
    %27 = math.exp %26 : vector<8x8xf32>
    %cst_18 = arith.constant dense<0.000000e+00> : vector<8xf32>
    %28 = vector.multi_reduction <add>, %27, %cst_18 [1] : vector<8x8xf32> to vector<8xf32>
    %29 = vector.shape_cast %28 : vector<8xf32> to vector<8x1xf32>
    %30 = math.log %29 : vector<8x1xf32>
    %31 = vector.broadcast %30 : vector<8x1xf32> to vector<8x8xf32>
    %32 = arith.subf %26, %31 : vector<8x8xf32>
    %c0_19 = arith.constant 0 : index
    %c0_20 = arith.constant 0 : index
    %33 = vector.load %arg8[%c0_19, %c0_20] : memref<8x8xf32, #tpu.memory_space<vmem>>, vector<8x8xf32>
    tpu.vector_store %arg8[%c0_19, %c0_20], %32 {strides = array<i32>} : memref<8x8xf32, #tpu.memory_space<vmem>>, vector<8x8xf32>,
    return
  }
  func.func @transform_0(%arg0: i32) -> (i32, i32) {
    %c0_i32 = arith.constant 0 : i32
    %c0_i32_0 = arith.constant 0 : i32
    return %arg0, %c0_i32 : i32, i32
  }
  func.func @transform_1(%arg0: i32) -> (i32, i32) {
    %c0_i32 = arith.constant 0 : i32
    %c0_i32_0 = arith.constant 0 : i32
    %c0_i32_1 = arith.constant 0 : i32
    return %c0_i32, %c0_i32_0 : i32, i32
  }
  func.func @transform_2(%arg0: i32) -> (i32, i32) {
    %c0_i32 = arith.constant 0 : i32
    %c0_i32_0 = arith.constant 0 : i32
    %c0_i32_1 = arith.constant 0 : i32
    return %c0_i32, %c0_i32_0 : i32, i32
  }
  func.func @transform_3(%arg0: i32) -> (i32, i32) {
    %c0_i32 = arith.constant 0 : i32
    %c0_i32_0 = arith.constant 0 : i32
    %c0_i32_1 = arith.constant 0 : i32
    return %c0_i32, %c0_i32_0 : i32, i32
  }
  func.func @transform_4(%arg0: i32) -> (i32, i32) {
    %c0_i32 = arith.constant 0 : i32
    %c0_i32_0 = arith.constant 0 : i32
    %c0_i32_1 = arith.constant 0 : i32
    return %c0_i32, %c0_i32_0 : i32, i32
  }
  func.func @transform_5(%arg0: i32) -> (i32, i32) {
    %c0_i32 = arith.constant 0 : i32
    %c0_i32_0 = arith.constant 0 : i32
    %c0_i32_1 = arith.constant 0 : i32
    return %c0_i32, %c0_i32_0 : i32, i32
  }
  func.func @transform_6(%arg0: i32) -> (i32, i32) {
    %c0_i32 = arith.constant 0 : i32
    %c0_i32_0 = arith.constant 0 : i32
    %c0_i32_1 = arith.constant 0 : i32
    return %c0_i32, %c0_i32_0 : i32, i32
  }
  func.func @transform_7(%arg0: i32) -> (i32, i32) {
    %c0_i32 = arith.constant 0 : i32
    %c0_i32_0 = arith.constant 0 : i32
    return %arg0, %c0_i32 : i32, i32
  }
}

</mosaic_0001>

<bundles_post_ra>
// kernel: tpu_custom_call.1
= control target key start
LH: loop header
LB: loop body
LE: loop exit
PB: predicated region body
PF: predicated region fallthrough
CT: control target
= control target key end

     0   :  { %vm48_vm0 = vcmask 1044480   ;;  %v365_v0 = vmov 0.0   ;;  %vm49_vm1 = vcmask 1045504   ;;  %v366_v2 = vmov 65535   ;;  %s460_s0 = inlined_call_operand.vmem [shape: f32[8,11], index: 0, kind: input, shape index: {}]   ;;  %s461_s1 = inlined_call_operand.vmem [shape: bf16[11,64], index: 1, kind: input, shape index: {}]   ;;  %s462_s2 = inlined_call_operand.vmem [shape: f32[1,64], index: 2, kind: input, shape index: {}]   ;;  %s463_s3 = inlined_call_operand.vmem [shape: bf16[64,32], index: 3, kind: input, shape index: {}]   ;;  %s464_s4 = inlined_call_operand.vmem [shape: f32[1,32], index: 4, kind: input, shape index: {}]   ;;  %s465_s5 = inlined_call_operand.vmem [shape: bf16[32,8], index: 5, kind: input, shape index: {}]   ;;  %s466_s6 = inlined_call_operand.vmem [shape: f32[1,8], index: 6, kind: input, shape index: {}]   ;;  %s467_s7 = inlined_call_operand.hbm [shape: f32[8,8], index: 7, kind: output, shape index: {}]  }
   0x1   :  { %300 = vmatprep.subr.bf16.mxu0 %v365_v0  ;;  %v330_v1 = vld [vmem:[%s461_s1] sm:$0x3f]   ;;  %306 = vmatprep.subr.bf16.mxu1 %v365_v0  ;;  %v50_v3 = vsel %vm48_vm0, 4294967295, %v366_v2  ;;  %vm367_vm2 = vmmov 0   ;;  %vm44_vm3 = vcmask 89088   ;;  %v332_v8 = vld [vmem:[%s463_s3 + $0x8] sm:$0xff]  }
   0x2   :  { %302 = vmatprep.mubr.msk.bf16.mxu0 %vm367_vm2, %v365_v0  ;;  %v28_v4 = vld [vmem:[%s460_s0] sm:$0xff]  ;;  %314 = vmatprep.mubr.msk.bf16.mxu1 %vm367_vm2, %v365_v0  ;;  %v51_v5 = vsel %vm49_vm1, %v50_v3, 0 }
   0x3   :  { %v331_v6 = vld [vmem:[%s463_s3] sm:$0xff]   ;;  %v53_v7 = vand.u32 %v330_v1, %v51_v5  ;;  %v29_v9 = vpack.c.bf16 %v28_v4, %v28_v4 }
   0x4   :  { %307 = vmatpush3.bf16.msra.mxu1 %v331_v6 }
   0x5   :  { %301 = vmatpush3.bf16.msra.mxu0 %v53_v7  ;;  %308 = vmatprep.subr.bf16.mxu1 %v365_v0 }
   0x6   :  { %318 = vmatprep.subr.bf16.mxu0 %v365_v0 }
   0x7   :  { %12 = vsyncpa [#allocation3], 0  ;;  %v333_v10 = vld [vmem:[%s463_s3 + $0x10] sm:$0xff]   ;;  %v334_v11 = vld [vmem:[%s463_s3 + $0x18] sm:$0xff]   ;;  %vm136_vm4 = vcmask 523264   ;;  %vm205_vm5 = vcmask 261120  }
   0x8   :  { %303 = vmatmul.mubr.msk.bf16.vlgmr.msra.gmra.mrb[0].mxu0 %vm44_vm3, %v29_v9  ;;  %309 = vmatpush3.bf16.msra.mxu1 %v332_v8  ;;  %v335_v12 = vld [vmem:[%s465_s5] sm:$0xff]   ;;  %v336_v21 = vld [vmem:[%s465_s5 + $0x8] sm:$0xff]   ;;  %vm249_vm6 = vcmask 64512  }
   0x9   :  { %310 = vmatprep.subr.bf16.mxu1 %v365_v0  ;;  %322 = vmatprep.mubr.msk.bf16.mxu0 %vm367_vm2, %v365_v0  ;;  %v277_v13 = vld [vmem:[%s462_s2] ss:$0 sm:$0xff] }
   0xa   :  { %319 = vmatpush3.bf16.msra.mxu0 %v335_v12  ;;  %v280_v22 = vld [vmem:[%s464_s4] ss:$0 sm:$0xff]  ;;  %s368_s4 = smov [#allocation2]  }
   0xb   :  { %320 = vmatprep.subr.bf16.mxu0 %v365_v0  ;;  %v286_v30 = vld [vmem:[%s466_s6] ss:$0 sm:$0xff]  ;;  %s269_s5 = sshll.u32 %s368_s4, 4  ;;  %s270_s5 = int_to_ptr.vmem [resolvable:$true] %s269_s5 }
   0xc   :  { %311 = vmatpush3.bf16.msra.mxu1 %v333_v10  ;;  %s341_s6 = scalar_lea.vmem %s270_s5, 128  ;;  %p346_p1 = scmp.lt.s32.totalorder %s270_s5, %s270_s5 }
   0xd   :  { %312 = vmatprep.subr.bf16.mxu1 %v365_v0  ;;  %p342_p0 = scmp.ne.s32.totalorder %s270_s5, %s341_s6  ;;  %p347_p2 = scmp.lt.s32.totalorder %s341_s6, %s341_s6 }
   0xe   :  { %321 = vmatpush3.bf16.msra.mxu0 %v336_v21 }
   0xf   :  { %p348_p3 = por %p347_p2, %p346_p1 }
  0x10   :  { %313 = vmatpush3.bf16.msra.mxu1 %v334_v11 }
  0x11   :  { %p349_p4 = pnand %p348_p3, %p342_p0 }
  0xdb   :  { %v89_v14 = vpop.f32.mrb[0].mxu0 }
  0xdc   :  { %v90_v15 = vadd.f32 %v277_v13, %v89_v14  ;;  %v304_v16 = vpop.f32.mrb[1].mxu0 }
  0xdd   :  { %v92_v17 = vpop.f32.mrb[2].mxu0 }
  0xde   :  { %v95_v18 = vmax.f32 %v90_v15, 0.0  ;;  %v305_v19 = vpop.f32.mrb[3].mxu0 }
  0xe0   :  { %v96_v20 = vpack.c.bf16 %v95_v18, %v95_v18 }
  0xe2   :  { %315 = vmatmul.mubr.msk.bf16.vlgmr.msra.gmra.mrb[0].mxu1 %vm136_vm4, %v96_v20 }
 0x1b5   :  { %v174_v23 = vpop.f32.mrb[0].mxu1 }
 0x1b6   :  { %v175_v24 = vadd.f32 %v280_v22, %v174_v23  ;;  %v316_v25 = vpop.f32.mrb[1].mxu1 }
 0x1b7   :  { %v177_v26 = vpop.f32.mrb[2].mxu1 }
 0x1b8   :  { %v180_v27 = vmax.f32 %v175_v24, 0.0  ;;  %v317_v28 = vpop.f32.mrb[3].mxu1 }
 0x1ba   :  { %v181_v29 = vpack.c.bf16 %v180_v27, %v180_v27 }
 0x1bc   :  { %323 = vmatmul.mubr.msk.bf16.vlgmr.msra.gmra.mrb[4].mxu0 %vm205_vm5, %v181_v29 }
 0x28f   :  { %v243_v31 = vpop.f32.mrb[4].mxu0 }
 0x290   :  { %v244_v32 = vadd.f32 %v286_v30, %v243_v31  ;;  %v324_v33 = vpop.f32.mrb[5].mxu0 }
 0x291   :  { %v246_v34 = vpop.f32.mrb[6].mxu0 }
 0x292   :  { %v325_v35 = vpop.f32.mrb[7].mxu0  ;;  %v250_v36 = vsel %vm249_vm6, %v244_v32, -inf }
 0x293   :  { %251 = vmax.xlane.f32.xlu0 %v250_v36 }
 0x320   :  { %v252_v37 = vpop.xlane.xlu0 %251 }
 0x321   :  { %v253_v38 = vsub.f32 %v244_v32, %v252_v37 }
 0x323   :  { %v254_v39 = vmul.f32 1.442695, %v253_v38 }
 0x325   :  { %337 = vpow2.f32 %v254_v39 }
 0x32f   :  { %v338_v40 = vpop.eup %337 }
 0x330   :  { %v256_v41 = vsel %vm249_vm6, %v338_v40, 0.0 }
 0x331   :  { %257 = vadd.xlane.f32.xlu0 %v256_v41 }
 0x3be   :  { %v258_v42 = vpop.xlane.xlu0 %257 }
 0x3bf   :  { %339 = vlog2.f32 %v258_v42 }
 0x3c9   :  { %v340_v43 = vpop.eup %339 }
 0x3ca   :  { %v260_v44 = vmul.f32 0.6931472, %v340_v43 }
 0x3cc   :  { %v261_v45 = vsub.f32 %v253_v38, %v260_v44 }
 0x3ce   :  { %262 = vst.msk [vmem:[#allocation2] sm:$0xff] %vm249_vm6, %v261_v45 }
 0x3cf   :  { %352 = shalt.err (!%p349_p4)
}
 0x3d0   :  { %s353_s21 = scalar_lea.hbm %s467_s7, 128 }
 0x3d1   :  { %p354_p5 = scmp.ne.s32.totalorder %s467_s7, %s353_s21  ;;  %p357_p6 = scmp.lt.u32.totalorder %s353_s21, %s467_s7 }
 0x3d3   :  { %p359_p7 = pnand %p357_p6, %p354_p5 }
 0x3d5   :  { %362 = shalt.err (!%p359_p7)
}
 0x3d6   :  { %272 = dma.vmem_to_hbm [thread:$0]  %s270_s5, 128, %s467_s7, [#allocation3]  }
 0x3d7   :  { %363 = dma.done.wait [#allocation3], 128  }
 0x3d8   :  { %364 = vsyncadd [#allocation3], 4294967168 }
 0x3d9   :  { %276 = vsyncpa [#allocation3], 1 }

</bundles_post_ra>
